<compile_context>
chip_gen: v7x
topology: tpu7x:2x2x1
jax: 0.10.0
libtpu: 0.0.40
codegen_flags: <defaults>
</compile_context>

<pallas_src>
import functools
import math

import jax
import jax.numpy as jnp
from jax.experimental import pallas as pl
from jax.experimental.pallas import tpu as pltpu


_GELU_C = math.sqrt(2.0 / math.pi)


# ----------------------------------------------------------------------------
# Helpers
# ----------------------------------------------------------------------------
def _round_up(x, m):
    return (x + m - 1) // m * m


def _device_kind():
    try:
        return jax.devices()[0].device_kind.lower()
    except Exception:
        return ""


def _use_bf16_gelu():
    # bf16 VALU / EUP exist on v6e and v7x; keep the GELU math in f32 on v5e
    # and older generations (no bf16 vector/EUP path there).
    kind = _device_kind()
    return ("v6" in kind) or ("v7" in kind)


def _vmem_limit_bytes():
    cap = None
    try:
        cap = int(pltpu.get_tpu_info().vmem_capacity_bytes)
    except Exception:
        cap = None
    if cap is None or cap <= 0:
        # Fallback heuristic: v7x has 64 MiB / TensorCore, v5e/v6e have 128 MiB.
        cap = (64 if "v7" in _device_kind() else 128) * 1024 * 1024
    limit = min(cap - 12 * 1024 * 1024, int(0.85 * cap))
    return max(limit, 32 * 1024 * 1024)


def _clamp_tm(tm, M):
    tm = min(tm, _round_up(M, 16))
    return max(16, _round_up(tm, 16))


def _gelu_tanh(h):
    """tanh-approx GELU; dtype follows `h` (python scalars are weakly typed)."""
    inner = jnp.tanh(_GELU_C * (h + 0.044715 * (h * h * h)))
    half_h = 0.5 * h
    return half_h + half_h * inner


def _gelu_to_bf16(h_f32, use_bf16_gelu):
    """GELU on the f32 pre-activation, returning bf16 for the second matmul."""
    if use_bf16_gelu:
        return _gelu_tanh(h_f32.astype(jnp.bfloat16))
    return _gelu_tanh(h_f32).astype(jnp.bfloat16)


def _resident_vmem_need(tm, C, H, x_bytes, out_bytes):
    need = 2 * tm * C * x_bytes            # x row tile (double-buffered)
    need += 2 * C * H * 2                  # W_fc, bf16 (default 2 buffers)
    need += 2 * H * C * 2                  # W_proj, bf16
    need += 2 * 8 * H * 4 + 2 * 8 * C * 4  # bias tiles (sublane-padded)
    need += 2 * tm * C * out_bytes         # output tile
    need += tm * H * 4 + tm * H * 2        # h (f32) + g (bf16) intermediates
    return need


def _streamed_vmem_need(tm, C, th, x_bytes, out_bytes):
    need = 2 * tm * C * x_bytes            # x row tile
    need += 2 * C * th * 2                 # W_fc column block
    need += 2 * th * C * 2                 # W_proj row block
    need += 2 * 8 * th * 4 + 2 * 8 * C * 4 # bias blocks
    need += 2 * tm * C * out_bytes         # output tile
    need += tm * C * 4                     # f32 accumulator scratch
    need += tm * th * 4 + tm * th * 2      # h (f32) + g (bf16) intermediates
    return need


def _pick_th(H, tm, C, budget, x_bytes, out_bytes):
    """Largest lane-aligned (multiple of 128) divisor of H that fits VMEM."""
    divs = [d for d in range(1, H + 1) if H % d == 0]
    lane_divs = [d for d in divs if d % 128 == 0] or divs
    for d in sorted(lane_divs, reverse=True):
        if _streamed_vmem_need(tm, C, d, x_bytes, out_bytes) <= budget:
            return d
    return min(lane_divs)


# ----------------------------------------------------------------------------
# Kernels
# ----------------------------------------------------------------------------
def _mlp_resident_kernel(x_ref, wfc_ref, bfc_ref, wproj_ref, bproj_ref, o_ref,
                         *, use_bf16_gelu):
    """Weight-resident fused MLP: one row tile per grid step, full weights in VMEM."""
    x = x_ref[...].astype(jnp.bfloat16)                       # cast the tile in-kernel
    h = jnp.dot(x, wfc_ref[...], preferred_element_type=jnp.float32)
    h = h + bfc_ref[...]
    g = _gelu_to_bf16(h, use_bf16_gelu)                       # bf16 MXU operand
    out = jnp.dot(g, wproj_ref[...], preferred_element_type=jnp.float32)
    out = out + bproj_ref[...]
    o_ref[...] = out.astype(o_ref.dtype)


def _mlp_streamed_kernel(x_ref, wfc_ref, bfc_ref, wproj_ref, bproj_ref, o_ref,
                         acc_ref, *, use_bf16_gelu):
    """Hidden-axis-tiled fallback with f32 accumulator (for weights too big for VMEM)."""
    k = pl.program_id(1)

    @pl.when(k == 0)
    def _():
        acc_ref[...] = jnp.broadcast_to(
            bproj_ref[...].astype(jnp.float32), acc_ref.shape)

    x = x_ref[...].astype(jnp.bfloat16)
    h = jnp.dot(x, wfc_ref[...], preferred_element_type=jnp.float32)
    h = h + bfc_ref[...]
    g = _gelu_to_bf16(h, use_bf16_gelu)
    acc_ref[...] += jnp.dot(g, wproj_ref[...], preferred_element_type=jnp.float32)

    @pl.when(k == pl.num_programs(1) - 1)
    def _():
        o_ref[...] = acc_ref[...].astype(o_ref.dtype)


# ----------------------------------------------------------------------------
# Wrapper
# ----------------------------------------------------------------------------
def mlp_forward(x, w_fc, b_fc, w_proj, b_proj, *, tm=None, th=None, mode="auto"):
    """x: (B, T, C); w_fc: (C, 4C); b_fc: (4C,); w_proj: (4C, C); b_proj: (C,)."""
    B, T, C = x.shape
    H = w_fc.shape[1]
    assert w_fc.shape == (C, H) and w_proj.shape == (H, C)
    M = B * T
    out_dtype = x.dtype
    x_bytes = x.dtype.itemsize
    out_bytes = jnp.dtype(out_dtype).itemsize

    use_bf16_gelu = _use_bf16_gelu()
    vmem_limit = _vmem_limit_bytes()
    budget = int(0.9 * vmem_limit)

    # ---- choose mode / tiles --------------------------------------------------
    tm_res = _clamp_tm(tm if tm is not None else 256, M)
    resident_need = _resident_vmem_need(tm_res, C, H, x_bytes, out_bytes)
    if mode == "auto":
        mode = "resident" if resident_need <= budget else "streamed"

    if mode == "resident":
        tm = tm_res
    else:
        # Larger row tile when weights must be streamed (intensity ~ tm).
        tm = _clamp_tm(tm if tm is not None else 512, M)
    M_pad = _round_up(M, tm)
    num_i = M_pad // tm

    # ---- operands --------------------------------------------------------------
    # Activations stay in their original dtype; the (tm, C) tile is cast to bf16
    # inside the kernel (no extra HBM round trip).  Weights are cast once here;
    # in production store them in bf16 (under jit this cast is const-folded).
    x2d = x.reshape(M, C)
    if M_pad != M:
        x2d = jnp.pad(x2d, ((0, M_pad - M), (0, 0)))
    w_fc_b = w_fc.astype(jnp.bfloat16)
    w_proj_b = w_proj.astype(jnp.bfloat16)
    b_fc2d = b_fc.reshape(1, H).astype(jnp.float32)
    b_proj2d = b_proj.reshape(1, C).astype(jnp.float32)

    if mode == "resident":
        kernel = functools.partial(_mlp_resident_kernel,
                                   use_bf16_gelu=use_bf16_gelu)
        cost = pl.CostEstimate(
            flops=4 * M_pad * C * H,
            transcendentals=M_pad * H,
            bytes_accessed=(M_pad * C * x_bytes + 2 * C * H * 2 + (H + C) * 4
                            + M_pad * C * out_bytes),
        )
        # Constant index maps for the weights/biases: Pallas fetches them once
        # (block index never changes) and they stay VMEM-resident across the
        # whole row loop.  TODO(synk): single-buffer these constant blocks via
        # pipeline_mode once pl.Buffered(1) is universally supported, to halve
        # their VMEM footprint on v7x.
        out2d = pl.pallas_call(
            kernel,
            out_shape=jax.ShapeDtypeStruct((M_pad, C), out_dtype),
            grid_spec=pltpu.PrefetchScalarGridSpec(
                num_scalar_prefetch=0,
                grid=(num_i,),
                in_specs=[
                    pl.BlockSpec((tm, C), lambda i: (i, 0)),   # x rows
                    pl.BlockSpec((C, H), lambda i: (0, 0)),    # W_fc (resident)
                    pl.BlockSpec((1, H), lambda i: (0, 0)),    # b_fc
                    pl.BlockSpec((H, C), lambda i: (0, 0)),    # W_proj (resident)
                    pl.BlockSpec((1, C), lambda i: (0, 0)),    # b_proj
                ],
                out_specs=pl.BlockSpec((tm, C), lambda i: (i, 0)),
            ),
            compiler_params=pltpu.CompilerParams(
                dimension_semantics=("parallel",),
                vmem_limit_bytes=vmem_limit,
            ),
            cost_estimate=cost,
        )(x2d, w_fc_b, b_fc2d, w_proj_b, b_proj2d)
    else:
        if th is None or H % th != 0:
            th = _pick_th(H, tm, C, budget, x_bytes, out_bytes)
        kt = H // th
        kernel = functools.partial(_mlp_streamed_kernel,
                                   use_bf16_gelu=use_bf16_gelu)
        cost = pl.CostEstimate(
            flops=4 * M_pad * C * H,
            transcendentals=M_pad * H,
            bytes_accessed=(M_pad * C * x_bytes + num_i * (2 * C * H * 2)
                            + (H + C) * 4 + M_pad * C * out_bytes),
        )
        out2d = pl.pallas_call(
            kernel,
            out_shape=jax.ShapeDtypeStruct((M_pad, C), out_dtype),
            grid_spec=pltpu.PrefetchScalarGridSpec(
                num_scalar_prefetch=0,
                grid=(num_i, kt),
                in_specs=[
                    pl.BlockSpec((tm, C), lambda i, k: (i, 0)),   # x rows
                    pl.BlockSpec((C, th), lambda i, k: (0, k)),   # W_fc column block
                    pl.BlockSpec((1, th), lambda i, k: (0, k)),   # b_fc block
                    pl.BlockSpec((th, C), lambda i, k: (k, 0)),   # W_proj row block
                    pl.BlockSpec((1, C), lambda i, k: (0, 0)),    # b_proj
                ],
                out_specs=pl.BlockSpec((tm, C), lambda i, k: (i, 0)),
                scratch_shapes=[pltpu.VMEM((tm, C), jnp.float32)],
            ),
            compiler_params=pltpu.CompilerParams(
                dimension_semantics=("parallel", "arbitrary"),
                vmem_limit_bytes=vmem_limit,
            ),
            cost_estimate=cost,
        )(x2d, w_fc_b, b_fc2d, w_proj_b, b_proj2d)

    return out2d[:M].reshape(B, T, C)


# ----------------------------------------------------------------------------
# References
# ----------------------------------------------------------------------------
def _reference_mlp_f32(x, w_fc, b_fc, w_proj, b_proj):
    h = jnp.dot(x, w_fc) + b_fc
    return jnp.dot(_gelu_tanh(h), w_proj) + b_proj


def _reference_mlp_matched(x, w_fc, b_fc, w_proj, b_proj, use_bf16_gelu):
    """Mirrors the kernel's dtype policy (bf16 MXU operands, f32 accumulation)."""
    B, T, C = x.shape
    x2 = x.reshape(-1, C).astype(jnp.bfloat16)
    h = jnp.dot(x2, w_fc.astype(jnp.bfloat16),
                preferred_element_type=jnp.float32) + b_fc.astype(jnp.float32)
    g = _gelu_to_bf16(h, use_bf16_gelu)
    out = jnp.dot(g, w_proj.astype(jnp.bfloat16),
                  preferred_element_type=jnp.float32) + b_proj.astype(jnp.float32)
    return out.astype(x.dtype).reshape(B, T, C)


# ----------------------------------------------------------------------------
# Self-test
# ----------------------------------------------------------------------------
if __name__ == "__main__":
    base_key = jax.random.PRNGKey(0)
    bf16_gelu = _use_bf16_gelu()

    def run_case(case_idx, B, T, C, **kw):
        H = 4 * C
        key = jax.random.fold_in(base_key, case_idx)
        kx, kwf, kbf, kwp, kbp = jax.random.split(key, 5)
        x = jax.random.normal(kx, (B, T, C), dtype=jnp.float32)
        # nn.Linear weights stored pre-transposed for row-major x @ W + b.
        w_fc = jax.random.normal(kwf, (C, H), dtype=jnp.float32) * 0.02
        b_fc = jax.random.normal(kbf, (H,), dtype=jnp.float32) * 0.02
        w_proj = jax.random.normal(kwp, (H, C), dtype=jnp.float32) * 0.02
        b_proj = jax.random.normal(kbp, (C,), dtype=jnp.float32) * 0.02

        out = mlp_forward(x, w_fc, b_fc, w_proj, b_proj, **kw)
        out = jax.block_until_ready(out)
        assert out.shape == (B, T, C)

        ref_match = _reference_mlp_matched(x, w_fc, b_fc, w_proj, b_proj, bf16_gelu)
        ref_f32 = _reference_mlp_f32(x, w_fc, b_fc, w_proj, b_proj)
        assert jnp.allclose(out, ref_match, atol=2e-3, rtol=2e-2), \
            f"case {case_idx}: mismatch vs dtype-matched reference"
        assert jnp.allclose(out, ref_f32, atol=2e-2, rtol=2e-2), \
            f"case {case_idx}: mismatch vs f32 reference"

    # Small config consistent with the module: n_embd=32, hidden=4*32=128.
    # Auto mode -> weight-resident fast path, grid=(1,).
    run_case(0, B=2, T=8, C=32)
    # Multiple row tiles through the resident path (grid=(4,)), weights fetched once.
    run_case(1, B=2, T=256, C=128, tm=128, mode="resident")
    # Force the streamed/accumulator fallback (grid=(2,2)) to validate the
    # pl.when init/finalize path used for large-C configurations.
    run_case(2, B=2, T=128, C=128, tm=128, th=256, mode="streamed")

    print("KERNEL_OK")
</pallas_src>

<mosaic_0001>
module attributes {stable_mosaic.version = 11 : i64} {
  func.func @_mlp_resident_kernel(%arg0: i32, %arg1: memref<16x32xf32, #tpu.memory_space<vmem>>, %arg2: memref<32x128xbf16, #tpu.memory_space<vmem>>, %arg3: memref<1x128xf32, #tpu.memory_space<vmem>>, %arg4: memref<128x32xbf16, #tpu.memory_space<vmem>>, %arg5: memref<1x32xf32, #tpu.memory_space<vmem>>, %arg6: memref<16x32xf32, #tpu.memory_space<vmem>>) attributes {dimension_semantics = [#tpu.dimension_semantics<parallel>], iteration_bounds = array<i64: 1>, scalar_prefetch = 0 : i64, scratch_operands = 0 : i64, tpu.core_type = #tpu.core_type<tc>, window_params = [{transform_indices = @transform_0, window_bounds = array<i64: 16, 32>}, {pipeline_mode = #tpu.pipeline_mode<synchronous>, transform_indices = @transform_1, window_bounds = array<i64: 32, 128>}, {pipeline_mode = #tpu.pipeline_mode<synchronous>, transform_indices = @transform_2, window_bounds = array<i64: 1, 128>}, {pipeline_mode = #tpu.pipeline_mode<synchronous>, transform_indices = @transform_3, window_bounds = array<i64: 128, 32>}, {pipeline_mode = #tpu.pipeline_mode<synchronous>, transform_indices = @transform_4, window_bounds = array<i64: 1, 32>}, {transform_indices = @transform_5, window_bounds = array<i64: 16, 32>}]} {
    %c0 = arith.constant 0 : index
    %c0_0 = arith.constant 0 : index
    %0 = vector.load %arg1[%c0, %c0_0] : memref<16x32xf32, #tpu.memory_space<vmem>>, vector<16x32xf32>
    %1 = arith.truncf %0 : vector<16x32xf32> to vector<16x32xbf16>
    %c0_1 = arith.constant 0 : index
    %c0_2 = arith.constant 0 : index
    %2 = vector.load %arg2[%c0_1, %c0_2] : memref<32x128xbf16, #tpu.memory_space<vmem>>, vector<32x128xbf16>
    %cst = arith.constant dense<0.000000e+00> : vector<16x128xf32>
    %3 = tpu.matmul %1, %2, %cst {dimension_numbers = #tpu.dot_dimension_numbers<[1], [0], [0], [1], [0, 0, 1, 1], [], []>} : vector<16x32xbf16>, vector<32x128xbf16>, vector<16x128xf32> -> vector<16x128xf32>
    %c0_3 = arith.constant 0 : index
    %c0_4 = arith.constant 0 : index
    %4 = vector.load %arg3[%c0_3, %c0_4] : memref<1x128xf32, #tpu.memory_space<vmem>>, vector<1x128xf32>
    %5 = vector.broadcast %4 : vector<1x128xf32> to vector<16x128xf32>
    %6 = arith.addf %3, %5 : vector<16x128xf32>
    %7 = arith.mulf %6, %6 : vector<16x128xf32>
    %8 = arith.mulf %7, %6 : vector<16x128xf32>
    %cst_5 = arith.constant 4.471500e-02 : f32
    %9 = vector.broadcast %cst_5 : f32 to vector<16x128xf32>
    %10 = arith.mulf %9, %8 : vector<16x128xf32>
    %11 = arith.addf %6, %10 : vector<16x128xf32>
    %cst_6 = arith.constant 0.797884583 : f32
    %12 = vector.broadcast %cst_6 : f32 to vector<16x128xf32>
    %13 = arith.mulf %12, %11 : vector<16x128xf32>
    %14 = math.tanh %13 : vector<16x128xf32>
    %cst_7 = arith.constant 5.000000e-01 : f32
    %15 = vector.broadcast %cst_7 : f32 to vector<16x128xf32>
    %16 = arith.mulf %15, %6 : vector<16x128xf32>
    %17 = arith.mulf %16, %14 : vector<16x128xf32>
    %18 = arith.addf %16, %17 : vector<16x128xf32>
    %19 = arith.truncf %18 : vector<16x128xf32> to vector<16x128xbf16>
    %c0_8 = arith.constant 0 : index
    %c0_9 = arith.constant 0 : index
    %20 = vector.load %arg4[%c0_8, %c0_9] : memref<128x32xbf16, #tpu.memory_space<vmem>>, vector<128x32xbf16>
    %cst_10 = arith.constant dense<0.000000e+00> : vector<16x32xf32>
    %21 = tpu.matmul %19, %20, %cst_10 {dimension_numbers = #tpu.dot_dimension_numbers<[1], [0], [0], [1], [0, 0, 1, 1], [], []>} : vector<16x128xbf16>, vector<128x32xbf16>, vector<16x32xf32> -> vector<16x32xf32>
    %c0_11 = arith.constant 0 : index
    %c0_12 = arith.constant 0 : index
    %22 = vector.load %arg5[%c0_11, %c0_12] : memref<1x32xf32, #tpu.memory_space<vmem>>, vector<1x32xf32>
    %23 = vector.broadcast %22 : vector<1x32xf32> to vector<16x32xf32>
    %24 = arith.addf %21, %23 : vector<16x32xf32>
    %c0_13 = arith.constant 0 : index
    %c0_14 = arith.constant 0 : index
    %25 = vector.load %arg6[%c0_13, %c0_14] : memref<16x32xf32, #tpu.memory_space<vmem>>, vector<16x32xf32>
    tpu.vector_store %arg6[%c0_13, %c0_14], %24 {strides = array<i32>} : memref<16x32xf32, #tpu.memory_space<vmem>>, vector<16x32xf32>,
    return
  }
  func.func @transform_0(%arg0: i32) -> (i32, i32) {
    %c0_i32 = arith.constant 0 : i32
    %c0_i32_0 = arith.constant 0 : i32
    return %arg0, %c0_i32 : i32, i32
  }
  func.func @transform_1(%arg0: i32) -> (i32, i32) {
    %c0_i32 = arith.constant 0 : i32
    %c0_i32_0 = arith.constant 0 : i32
    %c0_i32_1 = arith.constant 0 : i32
    return %c0_i32, %c0_i32_0 : i32, i32
  }
  func.func @transform_2(%arg0: i32) -> (i32, i32) {
    %c0_i32 = arith.constant 0 : i32
    %c0_i32_0 = arith.constant 0 : i32
    %c0_i32_1 = arith.constant 0 : i32
    return %c0_i32, %c0_i32_0 : i32, i32
  }
  func.func @transform_3(%arg0: i32) -> (i32, i32) {
    %c0_i32 = arith.constant 0 : i32
    %c0_i32_0 = arith.constant 0 : i32
    %c0_i32_1 = arith.constant 0 : i32
    return %c0_i32, %c0_i32_0 : i32, i32
  }
  func.func @transform_4(%arg0: i32) -> (i32, i32) {
    %c0_i32 = arith.constant 0 : i32
    %c0_i32_0 = arith.constant 0 : i32
    %c0_i32_1 = arith.constant 0 : i32
    return %c0_i32, %c0_i32_0 : i32, i32
  }
  func.func @transform_5(%arg0: i32) -> (i32, i32) {
    %c0_i32 = arith.constant 0 : i32
    %c0_i32_0 = arith.constant 0 : i32
    return %arg0, %c0_i32 : i32, i32
  }
}

</mosaic_0001>

<bundles_post_ra>
// kernel: tpu_custom_call.1
= control target key start
LH: loop header
LB: loop body
LE: loop exit
PB: predicated region body
PF: predicated region fallthrough
CT: control target
= control target key end

     0   :  { %10 = vsyncpa [#allocation3], 0  ;;  %s651_s0 = inlined_call_operand.hbm [shape: f32[16,32], index: 0, kind: input, shape index: {}]   ;;  %s652_s1 = inlined_call_operand.hbm [shape: bf16[32,128], index: 1, kind: input, shape index: {}]   ;;  %s653_s2 = inlined_call_operand.hbm [shape: f32[1,128], index: 2, kind: input, shape index: {}]   ;;  %s654_s3 = inlined_call_operand.hbm [shape: bf16[128,32], index: 3, kind: input, shape index: {}]   ;;  %s655_s4 = inlined_call_operand.hbm [shape: f32[1,32], index: 4, kind: input, shape index: {}]   ;;  %s656_s5 = inlined_call_operand.hbm [shape: f32[16,32], index: 5, kind: output, shape index: {}]  }
   0x1   :  { %11 = vsyncpa [#allocation6], 0 }
   0x2   :  { %12 = vsyncpa [#allocation9], 0 }
   0x3   :  { %13 = vsyncpa [#allocation4], 0  ;;  %s528_s18 = smov [#allocation5]   ;;  %s388_s22 = scalar_lea.hbm %s652_s1, 256 }
   0x4   :  { %s31_s19 = sshll.u32 %s528_s18, 4  ;;  %p389_p0 = scmp.ne.s32.totalorder %s652_s1, %s388_s22  ;;  %s32_s19 = int_to_ptr.vmem [resolvable:$true] %s31_s19 }
   0x5   :  { %p392_p1 = scmp.lt.u32.totalorder %s388_s22, %s652_s1 }
   0x7   :  { %p394_p2 = pnand %p392_p1, %p389_p0 }
   0x9   :  { %397 = shalt.err (!%p394_p2)
}
   0xa   :  { %s398_s27 = scalar_lea.vmem %s32_s19, 256  ;;  %p403_p4 = scmp.lt.s32.totalorder %s32_s19, %s32_s19 }
   0xb   :  { %p399_p3 = scmp.ne.s32.totalorder %s32_s19, %s398_s27  ;;  %p404_p5 = scmp.lt.s32.totalorder %s398_s27, %s398_s27 }
   0xd   :  { %p405_p6 = por %p404_p5, %p403_p4 }
   0xf   :  { %p406_p7 = pnand %p405_p6, %p399_p3 }
  0x11   :  { %409 = shalt.err (!%p406_p7)
}
  0x12   :  { %s529_s28 = smov 64   ;;  %s530_s29 = smov 4  }
  0x13   :  { %37 = dma.hbm_to_vmem [thread:$0]  %s652_s1, 256, %s32_s19, [#allocation6], %s529_s28, %s529_s28, %s530_s29  }
  0x14   :  { %s531_s7 = smov [#allocation8]   ;;  %s532_s9 = smov [#allocation2]  }
  0x15   :  { %s53_s8 = sshll.u32 %s531_s7, 4  ;;  %s19_s10 = sshll.u32 %s532_s9, 4  ;;  %s54_s8 = int_to_ptr.vmem [resolvable:$true] %s53_s8  ;;  %s20_s10 = int_to_ptr.vmem [resolvable:$true] %s19_s10 }
  0x16   :  { %s410_s13 = scalar_lea.hbm %s654_s3, 1024 }
  0x17   :  { %p411_p8 = scmp.ne.s32.totalorder %s654_s3, %s410_s13  ;;  %p414_p9 = scmp.lt.u32.totalorder %s410_s13, %s654_s3 }
  0x19   :  { %p416_p10 = pnand %p414_p9, %p411_p8 }
  0x1b   :  { %419 = shalt.err (!%p416_p10)
}
  0x1c   :  { %s420_s1 = scalar_lea.vmem %s54_s8, 1024  ;;  %p425_p12 = scmp.lt.s32.totalorder %s54_s8, %s54_s8 }
  0x1d   :  { %p421_p11 = scmp.ne.s32.totalorder %s54_s8, %s420_s1  ;;  %p426_p13 = scmp.lt.s32.totalorder %s420_s1, %s420_s1 }
  0x1f   :  { %p427_p0 = por %p426_p13, %p425_p12 }
  0x21   :  { %p428_p1 = pnand %p427_p0, %p421_p11 }
  0x23   :  { %431 = shalt.err (!%p428_p1)
}
  0x24   :  { %59 = dma.hbm_to_vmem [thread:$0]  %s654_s3, 1024, %s54_s8, [#allocation9], %s529_s28, %s529_s28, %s530_s29  }
  0x25   :  { %s432_s22 = scalar_lea.hbm %s651_s0, 256 }
  0x26   :  { %p433_p2 = scmp.ne.s32.totalorder %s651_s0, %s432_s22  ;;  %p436_p3 = scmp.lt.u32.totalorder %s432_s22, %s651_s0 }
  0x28   :  { %p438_p4 = pnand %p436_p3, %p433_p2 }
  0x2a   :  { %441 = shalt.err (!%p438_p4)
}
  0x2b   :  { %s442_s27 = scalar_lea.vmem %s20_s10, 256  ;;  %p447_p6 = scmp.lt.s32.totalorder %s20_s10, %s20_s10 }
  0x2c   :  { %p443_p5 = scmp.ne.s32.totalorder %s20_s10, %s442_s27  ;;  %p448_p7 = scmp.lt.s32.totalorder %s442_s27, %s442_s27 }
  0x2e   :  { %p449_p8 = por %p448_p7, %p447_p6 }
  0x30   :  { %p450_p9 = pnand %p449_p8, %p443_p5 }
  0x32   :  { %453 = shalt.err (!%p450_p9)
}
  0x33   :  { %s533_s3 = smov 128   ;;  %s534_s28 = smov 8  }
  0x34   :  { %25 = dma.hbm_to_vmem [thread:$0]  %s651_s0, 256, %s20_s10, [#allocation3], %s533_s3, %s533_s3, %s534_s28  }
  0x35   :  { %s535_s6 = smov [#allocation7]   ;;  %s536_s8 = smov [#allocation10]  }
  0x36   :  { %s44_s7 = sshll.u32 %s535_s6, 4  ;;  %s66_s9 = sshll.u32 %s536_s8, 4  ;;  %s45_s7 = int_to_ptr.vmem [resolvable:$true] %s44_s7  ;;  %s67_s9 = int_to_ptr.vmem [resolvable:$true] %s66_s9 }
  0x37   :  { %s454_s13 = scalar_lea.hbm %s653_s2, 16 }
  0x38   :  { %p455_p10 = scmp.ne.s32.totalorder %s653_s2, %s454_s13  ;;  %p458_p11 = scmp.lt.u32.totalorder %s454_s13, %s653_s2 }
  0x3a   :  { %p460_p12 = pnand %p458_p11, %p455_p10 }
  0x3c   :  { %463 = shalt.err (!%p460_p12)
}
  0x3d   :  { %s464_s0 = scalar_lea.vmem %s45_s7, 16  ;;  %s468_s10 = scalar_lea.vmem %s45_s7, 32 }
  0x3e   :  { %p465_p13 = scmp.ne.s32.totalorder %s45_s7, %s464_s0  ;;  %p469_p0 = scmp.lt.s32.totalorder %s45_s7, %s45_s7 }
  0x3f   :  { %p470_p1 = scmp.lt.s32.totalorder %s468_s10, %s464_s0 }
  0x41   :  { %p471_p2 = por %p470_p1, %p469_p0 }
  0x43   :  { %p472_p3 = pnand %p471_p2, %p465_p13 }
  0x45   :  { %475 = shalt.err (!%p472_p3)
}
  0x46   :  { %47 = dma.hbm_to_vmem [thread:$0]  %s653_s2, 16, %s45_s7, [#allocation6]  }
  0x47   :  { %s476_s21 = scalar_lea.hbm %s655_s4, 16 }
  0x48   :  { %p477_p4 = scmp.ne.s32.totalorder %s655_s4, %s476_s21  ;;  %p480_p5 = scmp.lt.u32.totalorder %s476_s21, %s655_s4 }
  0x4a   :  { %p482_p6 = pnand %p480_p5, %p477_p4 }
  0x4c   :  { %485 = shalt.err (!%p482_p6)
}
  0x4d   :  { %s486_s26 = scalar_lea.vmem %s67_s9, 16  ;;  %s490_s27 = scalar_lea.vmem %s67_s9, 32 }
  0x4e   :  { %p487_p7 = scmp.ne.s32.totalorder %s67_s9, %s486_s26  ;;  %p491_p8 = scmp.lt.s32.totalorder %s67_s9, %s67_s9 }
  0x4f   :  { %p492_p9 = scmp.lt.s32.totalorder %s490_s27, %s486_s26 }
  0x51   :  { %p493_p10 = por %p492_p9, %p491_p8 }
  0x53   :  { %p494_p11 = pnand %p493_p10, %p487_p7 }
  0x55   :  { %497 = shalt.err (!%p494_p11)
}
  0x56   :  { %69 = dma.hbm_to_vmem [thread:$0]  %s655_s4, 16, %s67_s9, [#allocation9]  }
  0x57   :  { %520 = dma.done.wait [#allocation3], 256  }
  0x58   :  { %521 = vsyncadd [#allocation3], 4294967040 }
  0x59   :  { %522 = dma.done.wait [#allocation6], 272  }
  0x5a   :  { %523 = vsyncadd [#allocation6], 4294967024 }
  0x5b   :  { %524 = dma.done.wait [#allocation9], 1040  }
  0x5c   :  { %525 = vsyncadd [#allocation9], 4294966256  ;;  %v537_v0 = vmov 0.0   ;;  %vm538_vm0 = vmmov 0   ;;  %v374_v1 = vld [vmem:[#allocation5] sm:$0xff]   ;;  %v375_v2 = vld [vmem:[#allocation5 + $0x8] sm:$0xff]  }
  0x5d   :  { %334 = vmatprep.subr.bf16.mxu0 %v537_v0  ;;  %338 = vmatprep.mubr.msk.bf16.mxu0 %vm538_vm0, %v537_v0  ;;  %v86_v3 = vld [vmem:[#allocation2] sm:$0xff]  ;;  %v87_v4 = vld [vmem:[#allocation2 + $0x8] sm:$0xff]  ;;  %vm112_vm1 = vcmask 261120   ;;  %v378_v8 = vld [vmem:[#allocation8 + $0x10] sm:$0xff]   ;;  %s539_s4 = smov [#allocation11]  }
  0x5e   :  { %342 = vmatprep.subr.bf16.mxu1 %v537_v0  ;;  %358 = vmatprep.mubr.msk.bf16.mxu1 %vm538_vm0, %v537_v0  ;;  %v88_v5 = vpack.c.bf16 %v87_v4, %v86_v3  ;;  %v376_v6 = vld [vmem:[#allocation8] sm:$0xff]   ;;  %v377_v7 = vld [vmem:[#allocation8 + $0x8] sm:$0xff]   ;;  %v379_v9 = vld [vmem:[#allocation8 + $0x18] sm:$0xff]   ;;  %s295_s30 = sshll.u32 %s539_s4, 4  ;;  %s296_s30 = int_to_ptr.vmem [resolvable:$true] %s295_s30 }
  0x5f   :  { %335 = vmatpush3.bf16.msra.mxu0 %v374_v1  ;;  %343 = vmatpush3.bf16.msra.mxu1 %v376_v6  ;;  %v380_v10 = vld [vmem:[#allocation8 + $0x20] sm:$0xff]   ;;  %v381_v11 = vld [vmem:[#allocation8 + $0x28] sm:$0xff]   ;;  %v382_v12 = vld [vmem:[#allocation8 + $0x30] sm:$0xff]   ;;  %s498_s6 = scalar_lea.vmem %s296_s30, 256  ;;  %p503_p13 = scmp.lt.s32.totalorder %s296_s30, %s296_s30 }
  0x60   :  { %336 = vmatprep.subr.bf16.mxu0 %v537_v0  ;;  %344 = vmatprep.subr.bf16.mxu1 %v537_v0  ;;  %v383_v13 = vld [vmem:[#allocation8 + $0x38] sm:$0xff]   ;;  %v313_v40 = vld [vmem:[#allocation10] ss:$0 sm:$0xff]  ;;  %p499_p12 = scmp.ne.s32.totalorder %s296_s30, %s498_s6  ;;  %p504_p0 = scmp.lt.s32.totalorder %s498_s6, %s498_s6 }
  0x61   :  { %v309_v14 = vld [vmem:[#allocation7] ss:$0 sm:$0xff] }
  0x62   :  { %p505_p1 = por %p504_p0, %p503_p13 }
  0x63   :  { %337 = vmatpush3.bf16.msra.mxu0 %v375_v2  ;;  %345 = vmatpush3.bf16.msra.mxu1 %v377_v7 }
  0x64   :  { %346 = vmatprep.subr.bf16.mxu1 %v537_v0  ;;  %p506_p2 = pnand %p505_p1, %p499_p12 }
  0x66   :  { %339 = vmatmul.mubr.msk.bf16.vlgmr.msra.gmra.mrb[0].mxu0 %vm112_vm1, %v88_v5 }
  0x67   :  { %347 = vmatpush3.bf16.msra.mxu1 %v378_v8 }
  0x68   :  { %348 = vmatprep.subr.bf16.mxu1 %v537_v0 }
  0x6b   :  { %349 = vmatpush3.bf16.msra.mxu1 %v379_v9 }
  0x6c   :  { %350 = vmatprep.subr.bf16.mxu1 %v537_v0 }
  0x6f   :  { %351 = vmatpush3.bf16.msra.mxu1 %v380_v10 }
  0x70   :  { %352 = vmatprep.subr.bf16.mxu1 %v537_v0 }
  0x73   :  { %353 = vmatpush3.bf16.msra.mxu1 %v381_v11 }
  0x74   :  { %354 = vmatprep.subr.bf16.mxu1 %v537_v0 }
  0x77   :  { %355 = vmatpush3.bf16.msra.mxu1 %v382_v12 }
  0x78   :  { %356 = vmatprep.subr.bf16.mxu1 %v537_v0 }
  0x7b   :  { %357 = vmatpush3.bf16.msra.mxu1 %v383_v13 }
 0x139   :  { %v150_v15 = vpop.f32.mrb[0].mxu0 }
 0x13a   :  { %v151_v16 = vadd.f32 %v309_v14, %v150_v15  ;;  %v340_v17 = vpop.f32.mrb[1].mxu0 }
 0x13b   :  { %v153_v18 = vpop.f32.mrb[2].mxu0 }
 0x13c   :  { %v157_v19 = vmul.f32 %v151_v16, %v151_v16  ;;  %v154_v20 = vadd.f32 %v309_v14, %v153_v18  ;;  %v341_v21 = vpop.f32.mrb[3].mxu0  ;;  %v169_v31 = vmul.f32 0.5, %v151_v16 }
 0x13e   :  { %v159_v22 = vmul.f32 %v157_v19, %v151_v16  ;;  %v158_v23 = vmul.f32 %v154_v20, %v154_v20  ;;  %v170_v33 = vmul.f32 0.5, %v154_v20 }
 0x140   :  { %v161_v24 = vmul.f32 0.044715, %v159_v22  ;;  %v160_v25 = vmul.f32 %v158_v23, %v154_v20 }
 0x142   :  { %v163_v26 = vadd.f32 %v161_v24, %v151_v16  ;;  %v162_v27 = vmul.f32 0.044715, %v160_v25 }
 0x144   :  { %v165_v28 = vmul.f32 0.7978846, %v163_v26  ;;  %v164_v29 = vadd.f32 %v162_v27, %v154_v20 }
 0x146   :  { %384 = vtanh.f32 %v165_v28  ;;  %v166_v30 = vmul.f32 0.7978846, %v164_v29 }
 0x148   :  { %386 = vtanh.f32 %v166_v30 }
 0x150   :  { %v385_v32 = vpop.eup %384 }
 0x151   :  { %v171_v34 = vmul.f32 %v385_v32, %v169_v31 }
 0x152   :  { %v387_v35 = vpop.eup %386 }
 0x153   :  { %v172_v36 = vmul.f32 %v387_v35, %v170_v33  ;;  %v173_v37 = vadd.f32 %v171_v34, %v169_v31 }
 0x155   :  { %v174_v38 = vadd.f32 %v172_v36, %v170_v33 }
 0x157   :  { %v175_v39 = vpack.c.bf16 %v174_v38, %v173_v37 }
 0x159   :  { %359 = vmatmul.mubr.bf16.vlgmr.msra.gmra.mrb[0].mxu1 %v175_v39 }
 0x22c   :  { %v281_v41 = vpop.f32.mrb[0].mxu1 }
 0x22d   :  { %v282_v42 = vadd.f32 %v313_v40, %v281_v41  ;;  %v360_v43 = vpop.f32.mrb[1].mxu1 }
 0x22e   :  { %v284_v44 = vpop.f32.mrb[2].mxu1 }
 0x22f   :  { %288 = vst.msk [vmem:[#allocation11] sm:$0xff] %vm112_vm1, %v282_v42  ;;  %v285_v45 = vadd.f32 %v313_v40, %v284_v44  ;;  %v361_v46 = vpop.f32.mrb[3].mxu1 }
 0x231   :  { %289 = vst.msk [vmem:[#allocation11 + $0x8] sm:$0xff] %vm112_vm1, %v285_v45 }
 0x232   :  { %509 = shalt.err (!%p506_p2)
}
 0x233   :  { %s510_s9 = scalar_lea.hbm %s656_s5, 256 }
 0x234   :  { %p511_p3 = scmp.ne.s32.totalorder %s656_s5, %s510_s9  ;;  %p514_p4 = scmp.lt.u32.totalorder %s510_s9, %s656_s5 }
 0x236   :  { %p516_p5 = pnand %p514_p4, %p511_p3 }
 0x238   :  { %519 = shalt.err (!%p516_p5)
}
 0x239   :  { %301 = dma.vmem_to_hbm [thread:$0]  %s296_s30, 256, %s656_s5, [#allocation4], %s533_s3, %s533_s3, %s534_s28  }
 0x23a   :  { %526 = dma.done.wait [#allocation4], 256  }
 0x23b   :  { %527 = vsyncadd [#allocation4], 4294967040 }
 0x23c   :  { %305 = vsyncpa [#allocation3], 1 }
 0x23d   :  { %306 = vsyncpa [#allocation6], 1 }
 0x23e   :  { %307 = vsyncpa [#allocation9], 1 }
 0x23f   :  { %308 = vsyncpa [#allocation4], 1 }

</bundles_post_ra>
